<compile_context>
chip_gen: v7x
topology: tpu7x:2x2x1
jax: 0.10.0
libtpu: 0.0.40
codegen_flags: <defaults>
</compile_context>

<pallas_src>
import numpy as np
import jax
import jax.numpy as jnp
from jax import lax
from jax.experimental import pallas as pl
from jax.experimental.pallas import tpu as pltpu

LEVELS = [8, 5, 5, 5]          # codebook_dim = 4, codebook_size = 1000
DIM = 8                        # self.dim  (!= effective_codebook_dim -> projections)
CODEBOOK_DIM = len(LEVELS)
EPS = 1e-3
MAX_BLOCK_ROWS = 512           # rows of 128 lanes per grid step (f32: 2 MiB/step in)


def _make_kernel(levels, w_in, b_in, dim, block_rows, chunk_rows, eps=EPS):
    """Build the kernel with all frozen parameters baked in as *scalar* literals.

    w_in: (codebook_dim, dim)  -- torch nn.Linear layout (out, in), frozen.
    b_in: (codebook_dim,)
    """
    cd = len(levels)
    lv = np.asarray(levels, dtype=np.float64)
    half_l = (lv - 1.0) * (1.0 + eps) / 2.0
    offset = np.where(lv % 2 == 0, 0.5, 0.0)
    shift = np.arctanh(offset / half_l)
    half_width = [float(int(l) // 2) for l in levels]
    basis = np.cumprod([1] + list(levels[:-1])).astype(np.int64)
    b_eff = np.asarray(b_in, dtype=np.float64) + shift       # fold tanh shift into bias
    w = np.asarray(w_in, dtype=np.float64)

    n_chunks = block_rows // chunk_rows
    assert n_chunks * chunk_rows == block_rows

    def chunk(z_ref, idx_ref, r0):
        # Dense (chunk_rows, 128) slabs per channel; cast to f32 per chunk
        # (cheap VPU op; keeps HBM traffic at the input's native width).
        zc = [z_ref[0, d, pl.ds(r0, chunk_rows), :].astype(jnp.float32)
              for d in range(dim)]
        idx_f = None
        for c in range(cd):
            # project_in row c: unrolled scalar-broadcast FMAs (VPU), no MXU.
            acc = zc[0] * float(w[c, 0])
            for d in range(1, dim):
                acc = acc + zc[d] * float(w[c, d])
            acc = acc + float(b_eff[c])
            # bound(): tanh squash into the level box (EUP), then round.
            bounded = jnp.tanh(acc) * float(half_l[c]) - float(offset[c])
            # round_ste(.)/hw * hw + hw  ==  round(.) + hw   (exact)
            digit = (jnp.round(bounded) + half_width[c]) * float(basis[c])
            idx_f = digit if idx_f is None else idx_f + digit
        # Exact small integers (<= 999) in f32; one convert + unmasked store.
        idx_ref[0, pl.ds(r0, chunk_rows), :] = idx_f.astype(jnp.int32)

    def fsq_kernel(z_ref, idx_ref):
        if n_chunks == 1:
            chunk(z_ref, idx_ref, 0)
        else:
            def body(i, carry):
                chunk(z_ref, idx_ref, pl.multiple_of(i * chunk_rows, chunk_rows))
                return carry
            lax.fori_loop(0, n_chunks, body, 0, unroll=min(8, n_chunks))

    return fsq_kernel


def fsq_forward_indices(x_nchw, w_in, b_in, levels=LEVELS, max_rows=MAX_BLOCK_ROWS):
    """FSQ forward. Returns codebook indices of shape (B, H, W), dtype int32."""
    B, D, H, W = x_nchw.shape
    cd = len(levels)
    assert w_in.shape == (cd, D) and b_in.shape == (cd,)
    hw = H * W

    # Free views only: keep NCHW memory order and native dtype.
    z = x_nchw.reshape(B, D, hw)
    pad = (-hw) % 128
    if pad:
        # Only for H*W not a multiple of 128; pads just to the next 128 lanes.
        z = jnp.pad(z, ((0, 0), (0, 0), (0, pad)))
    hw_p = hw + pad
    nrows = hw_p // 128
    z = z.reshape(B, D, nrows, 128)            # free view: spatial -> (rows, 128)

    # Block rows per grid step: as large as sensible (MiB-scale DMA), with the
    # last two block dims (R, 128) either (8,128)-aligned or the full extent.
    R = nrows if nrows <= max_rows else max_rows
    if R % 16 == 0:
        CH = 16
    elif R % 8 == 0:
        CH = 8
    else:
        CH = R
    grid_cols = pl.cdiv(nrows, R)

    kernel = _make_kernel(levels, np.asarray(w_in), np.asarray(b_in), D, R, CH)

    out = pl.pallas_call(
        kernel,
        out_shape=jax.ShapeDtypeStruct((B, nrows, 128), jnp.int32),
        grid_spec=pltpu.PrefetchScalarGridSpec(
            num_scalar_prefetch=0,
            grid=(B, grid_cols),
            in_specs=[pl.BlockSpec((1, D, R, 128), lambda b, j: (b, 0, j, 0))],
            out_specs=pl.BlockSpec((1, R, 128), lambda b, j: (b, j, 0)),
        ),
        compiler_params=pltpu.CompilerParams(
            dimension_semantics=("parallel", "parallel")),
    )(z)

    idx = out.reshape(B, nrows * 128)[:, :hw].reshape(B, H, W)
    # torch returns indices.long(); int32 is lossless here (codebook_size=1000).
    return idx


def fsq_reference_indices(x_nchw, w_in, b_in, levels=LEVELS, eps=EPS):
    """Pure-JAX mirror of the torch forward math. Returns (indices, bounded)."""
    B, D, H, W = x_nchw.shape
    lv = np.asarray(levels, dtype=np.float32)
    half_l = (lv - 1.0) * (1.0 + eps) / 2.0
    offset = np.where(np.asarray(levels) % 2 == 0, 0.5, 0.0).astype(np.float32)
    shift = np.arctanh(offset / half_l).astype(np.float32)
    half_width = np.asarray([l // 2 for l in levels], dtype=np.float32)
    basis = np.cumprod([1] + list(levels[:-1])).astype(np.float32)

    z = jnp.transpose(x_nchw, (0, 2, 3, 1)).reshape(B * H * W, D).astype(jnp.float32)
    zp = jnp.einsum('nd,cd->nc', z, jnp.asarray(w_in, jnp.float32),
                    precision=lax.Precision.HIGHEST) + jnp.asarray(b_in, jnp.float32)[None, :]
    bounded = jnp.tanh(zp + shift[None, :]) * half_l[None, :] - offset[None, :]
    codes = jnp.round(bounded) / half_width[None, :]
    zhat = codes * half_width[None, :] + half_width[None, :]
    idx = jnp.round(jnp.sum(zhat * basis[None, :], axis=-1)).astype(jnp.int32)
    return idx.reshape(B, H, W), bounded.reshape(B, H, W, len(levels))


def init_params(key, dim=DIM, cd=CODEBOOK_DIM):
    """project_in init mirroring the module: xavier_normal then L2-normalize each
    output row (dim=1); bias ~ U(-1/sqrt(dim), 1/sqrt(dim))."""
    kw, kb = jax.random.split(key)
    std = float(np.sqrt(2.0 / (dim + cd)))
    w = jax.random.normal(kw, (cd, dim), dtype=jnp.float32) * std      # (out, in)
    w = w / jnp.linalg.norm(w, axis=1, keepdims=True)
    bound = 1.0 / float(np.sqrt(dim))
    b = jax.random.uniform(kb, (cd,), dtype=jnp.float32, minval=-bound, maxval=bound)
    return np.asarray(w), np.asarray(b)


if __name__ == "__main__":
    key = jax.random.PRNGKey(0)
    kx, kp = jax.random.split(key)

    # NCHW input like the torch module: (B, dim, H, W)
    x = jax.random.normal(kx, (2, DIM, 16, 16), dtype=jnp.float32)
    w_in, b_in = init_params(kp)

    idx = jax.block_until_ready(fsq_forward_indices(x, w_in, b_in))

    ref_idx, ref_bounded = fsq_reference_indices(x, w_in, b_in)

    assert idx.shape == (2, 16, 16) and idx.dtype == jnp.int32
    assert bool(jnp.all((idx >= 0) & (idx < int(np.prod(LEVELS)))))

    # Exact match, except at positions where some channel lands within 1e-3 of
    # a rounding boundary (there the kernel's folded-bias FMA order vs. the
    # reference matmul may legitimately flip a round-to-nearest tie).
    near_boundary = jnp.any(
        jnp.abs(ref_bounded - jnp.round(ref_bounded)) > 0.5 - 1e-3, axis=-1)
    assert bool(jnp.all((idx == ref_idx) | near_boundary))
    assert float(jnp.mean((idx == ref_idx).astype(jnp.float32))) > 0.99

    print("KERNEL_OK")
</pallas_src>

<mosaic_0001>
module attributes {stable_mosaic.version = 11 : i64} {
  func.func @fsq_kernel(%arg0: i32, %arg1: i32, %arg2: memref<1x8x2x128xf32, #tpu.memory_space<vmem>>, %arg3: memref<1x2x128xi32, #tpu.memory_space<vmem>>) attributes {dimension_semantics = [#tpu.dimension_semantics<parallel>, #tpu.dimension_semantics<parallel>], iteration_bounds = array<i64: 2, 1>, scalar_prefetch = 0 : i64, scratch_operands = 0 : i64, tpu.core_type = #tpu.core_type<tc>, window_params = [{transform_indices = @transform_0, window_bounds = array<i64: 1, 8, 2, 128>}, {transform_indices = @transform_1, window_bounds = array<i64: 1, 2, 128>}]} {
    %c0 = arith.constant 0 : index
    %c0_0 = arith.constant 0 : index
    %c0_1 = arith.constant 0 : index
    %c0_2 = arith.constant 0 : index
    %0 = vector.load %arg2[%c0, %c0_0, %c0_1, %c0_2] : memref<1x8x2x128xf32, #tpu.memory_space<vmem>>, vector<1x1x2x128xf32>
    %1 = vector.shape_cast %0 : vector<1x1x2x128xf32> to vector<2x128xf32>
    %c0_3 = arith.constant 0 : index
    %c1 = arith.constant 1 : index
    %c0_4 = arith.constant 0 : index
    %c0_5 = arith.constant 0 : index
    %2 = vector.load %arg2[%c0_3, %c1, %c0_4, %c0_5] : memref<1x8x2x128xf32, #tpu.memory_space<vmem>>, vector<1x1x2x128xf32>
    %3 = vector.shape_cast %2 : vector<1x1x2x128xf32> to vector<2x128xf32>
    %c0_6 = arith.constant 0 : index
    %c2 = arith.constant 2 : index
    %c0_7 = arith.constant 0 : index
    %c0_8 = arith.constant 0 : index
    %4 = vector.load %arg2[%c0_6, %c2, %c0_7, %c0_8] : memref<1x8x2x128xf32, #tpu.memory_space<vmem>>, vector<1x1x2x128xf32>
    %5 = vector.shape_cast %4 : vector<1x1x2x128xf32> to vector<2x128xf32>
    %c0_9 = arith.constant 0 : index
    %c3 = arith.constant 3 : index
    %c0_10 = arith.constant 0 : index
    %c0_11 = arith.constant 0 : index
    %6 = vector.load %arg2[%c0_9, %c3, %c0_10, %c0_11] : memref<1x8x2x128xf32, #tpu.memory_space<vmem>>, vector<1x1x2x128xf32>
    %7 = vector.shape_cast %6 : vector<1x1x2x128xf32> to vector<2x128xf32>
    %c0_12 = arith.constant 0 : index
    %c4 = arith.constant 4 : index
    %c0_13 = arith.constant 0 : index
    %c0_14 = arith.constant 0 : index
    %8 = vector.load %arg2[%c0_12, %c4, %c0_13, %c0_14] : memref<1x8x2x128xf32, #tpu.memory_space<vmem>>, vector<1x1x2x128xf32>
    %9 = vector.shape_cast %8 : vector<1x1x2x128xf32> to vector<2x128xf32>
    %c0_15 = arith.constant 0 : index
    %c5 = arith.constant 5 : index
    %c0_16 = arith.constant 0 : index
    %c0_17 = arith.constant 0 : index
    %10 = vector.load %arg2[%c0_15, %c5, %c0_16, %c0_17] : memref<1x8x2x128xf32, #tpu.memory_space<vmem>>, vector<1x1x2x128xf32>
    %11 = vector.shape_cast %10 : vector<1x1x2x128xf32> to vector<2x128xf32>
    %c0_18 = arith.constant 0 : index
    %c6 = arith.constant 6 : index
    %c0_19 = arith.constant 0 : index
    %c0_20 = arith.constant 0 : index
    %12 = vector.load %arg2[%c0_18, %c6, %c0_19, %c0_20] : memref<1x8x2x128xf32, #tpu.memory_space<vmem>>, vector<1x1x2x128xf32>
    %13 = vector.shape_cast %12 : vector<1x1x2x128xf32> to vector<2x128xf32>
    %c0_21 = arith.constant 0 : index
    %c7 = arith.constant 7 : index
    %c0_22 = arith.constant 0 : index
    %c0_23 = arith.constant 0 : index
    %14 = vector.load %arg2[%c0_21, %c7, %c0_22, %c0_23] : memref<1x8x2x128xf32, #tpu.memory_space<vmem>>, vector<1x1x2x128xf32>
    %15 = vector.shape_cast %14 : vector<1x1x2x128xf32> to vector<2x128xf32>
    %cst = arith.constant 0.0915868133 : f32
    %16 = vector.broadcast %cst : f32 to vector<2x128xf32>
    %17 = arith.mulf %1, %16 : vector<2x128xf32>
    %cst_24 = arith.constant -0.35462755 : f32
    %18 = vector.broadcast %cst_24 : f32 to vector<2x128xf32>
    %19 = arith.mulf %3, %18 : vector<2x128xf32>
    %20 = arith.addf %17, %19 : vector<2x128xf32>
    %cst_25 = arith.constant -0.57958287 : f32
    %21 = vector.broadcast %cst_25 : f32 to vector<2x128xf32>
    %22 = arith.mulf %5, %21 : vector<2x128xf32>
    %23 = arith.addf %20, %22 : vector<2x128xf32>
    %cst_26 = arith.constant -0.189053699 : f32
    %24 = vector.broadcast %cst_26 : f32 to vector<2x128xf32>
    %25 = arith.mulf %7, %24 : vector<2x128xf32>
    %26 = arith.addf %23, %25 : vector<2x128xf32>
    %cst_27 = arith.constant -0.463054925 : f32
    %27 = vector.broadcast %cst_27 : f32 to vector<2x128xf32>
    %28 = arith.mulf %9, %27 : vector<2x128xf32>
    %29 = arith.addf %26, %28 : vector<2x128xf32>
    %cst_28 = arith.constant 0.131943062 : f32
    %30 = vector.broadcast %cst_28 : f32 to vector<2x128xf32>
    %31 = arith.mulf %11, %30 : vector<2x128xf32>
    %32 = arith.addf %29, %31 : vector<2x128xf32>
    %cst_29 = arith.constant 0.457951963 : f32
    %33 = vector.broadcast %cst_29 : f32 to vector<2x128xf32>
    %34 = arith.mulf %13, %33 : vector<2x128xf32>
    %35 = arith.addf %32, %34 : vector<2x128xf32>
    %cst_30 = arith.constant 0.229444548 : f32
    %36 = vector.broadcast %cst_30 : f32 to vector<2x128xf32>
    %37 = arith.mulf %15, %36 : vector<2x128xf32>
    %38 = arith.addf %35, %37 : vector<2x128xf32>
    %cst_31 = arith.constant -0.14562732 : f32
    %39 = vector.broadcast %cst_31 : f32 to vector<2x128xf32>
    %40 = arith.addf %38, %39 : vector<2x128xf32>
    %41 = math.tanh %40 : vector<2x128xf32>
    %cst_32 = arith.constant 3.503500e+00 : f32
    %42 = vector.broadcast %cst_32 : f32 to vector<2x128xf32>
    %43 = arith.mulf %41, %42 : vector<2x128xf32>
    %cst_33 = arith.constant 5.000000e-01 : f32
    %44 = vector.broadcast %cst_33 : f32 to vector<2x128xf32>
    %45 = arith.subf %43, %44 : vector<2x128xf32>
    %46 = math.roundeven %45 : vector<2x128xf32>
    %cst_34 = arith.constant 4.000000e+00 : f32
    %47 = vector.broadcast %cst_34 : f32 to vector<2x128xf32>
    %48 = arith.addf %46, %47 : vector<2x128xf32>
    %cst_35 = arith.constant 1.000000e+00 : f32
    %49 = vector.broadcast %cst_35 : f32 to vector<2x128xf32>
    %50 = arith.mulf %48, %49 : vector<2x128xf32>
    %cst_36 = arith.constant -0.42661652 : f32
    %51 = vector.broadcast %cst_36 : f32 to vector<2x128xf32>
    %52 = arith.mulf %1, %51 : vector<2x128xf32>
    %cst_37 = arith.constant 0.653455674 : f32
    %53 = vector.broadcast %cst_37 : f32 to vector<2x128xf32>
    %54 = arith.mulf %3, %53 : vector<2x128xf32>
    %55 = arith.addf %52, %54 : vector<2x128xf32>
    %cst_38 = arith.constant -0.00549640926 : f32
    %56 = vector.broadcast %cst_38 : f32 to vector<2x128xf32>
    %57 = arith.mulf %5, %56 : vector<2x128xf32>
    %58 = arith.addf %55, %57 : vector<2x128xf32>
    %cst_39 = arith.constant 0.258168161 : f32
    %59 = vector.broadcast %cst_39 : f32 to vector<2x128xf32>
    %60 = arith.mulf %7, %59 : vector<2x128xf32>
    %61 = arith.addf %58, %60 : vector<2x128xf32>
    %cst_40 = arith.constant -0.170791209 : f32
    %62 = vector.broadcast %cst_40 : f32 to vector<2x128xf32>
    %63 = arith.mulf %9, %62 : vector<2x128xf32>
    %64 = arith.addf %61, %63 : vector<2x128xf32>
    %cst_41 = arith.constant -0.29246065 : f32
    %65 = vector.broadcast %cst_41 : f32 to vector<2x128xf32>
    %66 = arith.mulf %11, %65 : vector<2x128xf32>
    %67 = arith.addf %64, %66 : vector<2x128xf32>
    %cst_42 = arith.constant 0.158764213 : f32
    %68 = vector.broadcast %cst_42 : f32 to vector<2x128xf32>
    %69 = arith.mulf %13, %68 : vector<2x128xf32>
    %70 = arith.addf %67, %69 : vector<2x128xf32>
    %cst_43 = arith.constant 0.429422975 : f32
    %71 = vector.broadcast %cst_43 : f32 to vector<2x128xf32>
    %72 = arith.mulf %15, %71 : vector<2x128xf32>
    %73 = arith.addf %70, %72 : vector<2x128xf32>
    %cst_44 = arith.constant -0.097433649 : f32
    %74 = vector.broadcast %cst_44 : f32 to vector<2x128xf32>
    %75 = arith.addf %73, %74 : vector<2x128xf32>
    %76 = math.tanh %75 : vector<2x128xf32>
    %cst_45 = arith.constant 2.002000e+00 : f32
    %77 = vector.broadcast %cst_45 : f32 to vector<2x128xf32>
    %78 = arith.mulf %76, %77 : vector<2x128xf32>
    %cst_46 = arith.constant 0.000000e+00 : f32
    %79 = vector.broadcast %cst_46 : f32 to vector<2x128xf32>
    %80 = arith.subf %78, %79 : vector<2x128xf32>
    %81 = math.roundeven %80 : vector<2x128xf32>
    %cst_47 = arith.constant 2.000000e+00 : f32
    %82 = vector.broadcast %cst_47 : f32 to vector<2x128xf32>
    %83 = arith.addf %81, %82 : vector<2x128xf32>
    %cst_48 = arith.constant 8.000000e+00 : f32
    %84 = vector.broadcast %cst_48 : f32 to vector<2x128xf32>
    %85 = arith.mulf %83, %84 : vector<2x128xf32>
    %86 = arith.addf %50, %85 : vector<2x128xf32>
    %cst_49 = arith.constant -0.0705340058 : f32
    %87 = vector.broadcast %cst_49 : f32 to vector<2x128xf32>
    %88 = arith.mulf %1, %87 : vector<2x128xf32>
    %cst_50 = arith.constant -0.290848255 : f32
    %89 = vector.broadcast %cst_50 : f32 to vector<2x128xf32>
    %90 = arith.mulf %3, %89 : vector<2x128xf32>
    %91 = arith.addf %88, %90 : vector<2x128xf32>
    %cst_51 = arith.constant 0.335722625 : f32
    %92 = vector.broadcast %cst_51 : f32 to vector<2x128xf32>
    %93 = arith.mulf %5, %92 : vector<2x128xf32>
    %94 = arith.addf %91, %93 : vector<2x128xf32>
    %cst_52 = arith.constant 0.184884369 : f32
    %95 = vector.broadcast %cst_52 : f32 to vector<2x128xf32>
    %96 = arith.mulf %7, %95 : vector<2x128xf32>
    %97 = arith.addf %94, %96 : vector<2x128xf32>
    %cst_53 = arith.constant -0.3276999 : f32
    %98 = vector.broadcast %cst_53 : f32 to vector<2x128xf32>
    %99 = arith.mulf %9, %98 : vector<2x128xf32>
    %100 = arith.addf %97, %99 : vector<2x128xf32>
    %cst_54 = arith.constant 0.308998019 : f32
    %101 = vector.broadcast %cst_54 : f32 to vector<2x128xf32>
    %102 = arith.mulf %11, %101 : vector<2x128xf32>
    %103 = arith.addf %100, %102 : vector<2x128xf32>
    %cst_55 = arith.constant 0.190376177 : f32
    %104 = vector.broadcast %cst_55 : f32 to vector<2x128xf32>
    %105 = arith.mulf %13, %104 : vector<2x128xf32>
    %106 = arith.addf %103, %105 : vector<2x128xf32>
    %cst_56 = arith.constant -0.724175572 : f32
    %107 = vector.broadcast %cst_56 : f32 to vector<2x128xf32>
    %108 = arith.mulf %15, %107 : vector<2x128xf32>
    %109 = arith.addf %106, %108 : vector<2x128xf32>
    %cst_57 = arith.constant 0.0859890952 : f32
    %110 = vector.broadcast %cst_57 : f32 to vector<2x128xf32>
    %111 = arith.addf %109, %110 : vector<2x128xf32>
    %112 = math.tanh %111 : vector<2x128xf32>
    %cst_58 = arith.constant 2.002000e+00 : f32
    %113 = vector.broadcast %cst_58 : f32 to vector<2x128xf32>
    %114 = arith.mulf %112, %113 : vector<2x128xf32>
    %cst_59 = arith.constant 0.000000e+00 : f32
    %115 = vector.broadcast %cst_59 : f32 to vector<2x128xf32>
    %116 = arith.subf %114, %115 : vector<2x128xf32>
    %117 = math.roundeven %116 : vector<2x128xf32>
    %cst_60 = arith.constant 2.000000e+00 : f32
    %118 = vector.broadcast %cst_60 : f32 to vector<2x128xf32>
    %119 = arith.addf %117, %118 : vector<2x128xf32>
    %cst_61 = arith.constant 4.000000e+01 : f32
    %120 = vector.broadcast %cst_61 : f32 to vector<2x128xf32>
    %121 = arith.mulf %119, %120 : vector<2x128xf32>
    %122 = arith.addf %86, %121 : vector<2x128xf32>
    %cst_62 = arith.constant -0.618572474 : f32
    %123 = vector.broadcast %cst_62 : f32 to vector<2x128xf32>
    %124 = arith.mulf %1, %123 : vector<2x128xf32>
    %cst_63 = arith.constant 0.0218111426 : f32
    %125 = vector.broadcast %cst_63 : f32 to vector<2x128xf32>
    %126 = arith.mulf %3, %125 : vector<2x128xf32>
    %127 = arith.addf %124, %126 : vector<2x128xf32>
    %cst_64 = arith.constant 0.660644114 : f32
    %128 = vector.broadcast %cst_64 : f32 to vector<2x128xf32>
    %129 = arith.mulf %5, %128 : vector<2x128xf32>
    %130 = arith.addf %127, %129 : vector<2x128xf32>
    %cst_65 = arith.constant -0.373411357 : f32
    %131 = vector.broadcast %cst_65 : f32 to vector<2x128xf32>
    %132 = arith.mulf %7, %131 : vector<2x128xf32>
    %133 = arith.addf %130, %132 : vector<2x128xf32>
    %cst_66 = arith.constant -0.0652077794 : f32
    %134 = vector.broadcast %cst_66 : f32 to vector<2x128xf32>
    %135 = arith.mulf %9, %134 : vector<2x128xf32>
    %136 = arith.addf %133, %135 : vector<2x128xf32>
    %cst_67 = arith.constant -0.0801424905 : f32
    %137 = vector.broadcast %cst_67 : f32 to vector<2x128xf32>
    %138 = arith.mulf %11, %137 : vector<2x128xf32>
    %139 = arith.addf %136, %138 : vector<2x128xf32>
    %cst_68 = arith.constant 0.174046353 : f32
    %140 = vector.broadcast %cst_68 : f32 to vector<2x128xf32>
    %141 = arith.mulf %13, %140 : vector<2x128xf32>
    %142 = arith.addf %139, %141 : vector<2x128xf32>
    %cst_69 = arith.constant -0.00621865736 : f32
    %143 = vector.broadcast %cst_69 : f32 to vector<2x128xf32>
    %144 = arith.mulf %15, %143 : vector<2x128xf32>
    %145 = arith.addf %142, %144 : vector<2x128xf32>
    %cst_70 = arith.constant -2.415290e-01 : f32
    %146 = vector.broadcast %cst_70 : f32 to vector<2x128xf32>
    %147 = arith.addf %145, %146 : vector<2x128xf32>
    %148 = math.tanh %147 : vector<2x128xf32>
    %cst_71 = arith.constant 2.002000e+00 : f32
    %149 = vector.broadcast %cst_71 : f32 to vector<2x128xf32>
    %150 = arith.mulf %148, %149 : vector<2x128xf32>
    %cst_72 = arith.constant 0.000000e+00 : f32
    %151 = vector.broadcast %cst_72 : f32 to vector<2x128xf32>
    %152 = arith.subf %150, %151 : vector<2x128xf32>
    %153 = math.roundeven %152 : vector<2x128xf32>
    %cst_73 = arith.constant 2.000000e+00 : f32
    %154 = vector.broadcast %cst_73 : f32 to vector<2x128xf32>
    %155 = arith.addf %153, %154 : vector<2x128xf32>
    %cst_74 = arith.constant 2.000000e+02 : f32
    %156 = vector.broadcast %cst_74 : f32 to vector<2x128xf32>
    %157 = arith.mulf %155, %156 : vector<2x128xf32>
    %158 = arith.addf %122, %157 : vector<2x128xf32>
    %159 = arith.fptosi %158 : vector<2x128xf32> to vector<2x128xi32>
    %c0_75 = arith.constant 0 : index
    %c0_76 = arith.constant 0 : index
    %c0_77 = arith.constant 0 : index
    %160 = vector.load %arg3[%c0_75, %c0_76, %c0_77] : memref<1x2x128xi32, #tpu.memory_space<vmem>>, vector<1x2x128xi32>
    %161 = vector.shape_cast %160 : vector<1x2x128xi32> to vector<2x128xi32>
    %162 = vector.shape_cast %159 : vector<2x128xi32> to vector<1x2x128xi32>
    tpu.vector_store %arg3[%c0_75, %c0_76, %c0_77], %162 {strides = array<i32>} : memref<1x2x128xi32, #tpu.memory_space<vmem>>, vector<1x2x128xi32>,
    return
  }
  func.func @transform_0(%arg0: i32, %arg1: i32) -> (i32, i32, i32, i32) {
    %c0_i32 = arith.constant 0 : i32
    %c0_i32_0 = arith.constant 0 : i32
    %c0_i32_1 = arith.constant 0 : i32
    return %arg0, %c0_i32, %arg1, %c0_i32_0 : i32, i32, i32, i32
  }
  func.func @transform_1(%arg0: i32, %arg1: i32) -> (i32, i32, i32) {
    %c0_i32 = arith.constant 0 : i32
    %c0_i32_0 = arith.constant 0 : i32
    return %arg0, %arg1, %c0_i32 : i32, i32, i32
  }
}

</mosaic_0001>

<bundles_post_ra>
// kernel: tpu_custom_call.1
= control target key start
LH: loop header
LB: loop body
LE: loop exit
PB: predicated region body
PF: predicated region fallthrough
CT: control target
= control target key end

     0   :  { %6 = vsyncpa [#allocation3], 0  ;;  %s755_s0 = inlined_call_operand.hbm [shape: f32[2,8,2,128], index: 0, kind: input, shape index: {}]   ;;  %s756_s1 = inlined_call_operand.hbm [shape: s32[2,2,128], index: 1, kind: output, shape index: {}]  }
   0x1   :  { %8 = vsyncpa [#allocation3 + $0x1], 0 }
   0x2   :  { %9 = vsyncpa [#allocation4], 0 }
   0x3   :  { %11 = vsyncpa [#allocation4 + $0x1], 0  ;;  %s581_s6 = smov 0   ;;  %s583_s7 = smov 0  }
   0x4   :  { %s585_s8 = smov 0   ;;  %s587_s9 = smov 0  }
   0x5   :  { %s589_s10 = smov 0   ;;  %s591_s11 = smov 0  }
   0x6 LB: > { %s352_s12 = sadd.s32 4294967295, %s565_s11   ;;  %s353_s13 = sadd.s32 4294967294, %s565_s11   ;;  %s565_s11 = sphi %s591_s11, %s17_s11   ;;  %s561_s10 = sphi %s589_s10, %s771_s10   ;;  %s557_s9 = sphi %s587_s9, %s770_s9   ;;  %s553_s8 = sphi %s585_s8, %s769_s8   ;;  %s549_s7 = sphi %s583_s7, %s768_s7   ;;  %s545_s6 = sphi %s581_s6, %s767_s6  }
   0x7   : > { %s29_s14 = sadd.s32 1, %s561_s10  ;;  %s38_s15 = sadd.s32 1, %s553_s8 }
   0x8   : > { %p31_p0 = scmp.ge.s32.totalorder %s29_s14, 2  ;;  %p45_p1 = scmp.ne.s32.totalorder %s553_s8, %s549_s7 }
   0x9   : > { %p46_p2 = scmp.eq.s32.totalorder %s565_s11, 0  ;;  %p51_p3 = scmp.ne.s32.totalorder %s549_s7, %s545_s6 }
   0xa   : > { %s773_s14 = smov (%p31_p0, %s29_s14), 0  ;;  %p52_p5 = scmp.eq.s32.totalorder %s352_s12, 0 }
   0xb   : > { %p622_p4 = por %p46_p2, %p45_p1  ;;  %s33_s17 = ssub.s32 %s561_s10, %s773_s14 }
   0xc   : > { %p77_p6 = scmp.eq.s32.totalorder %s352_s12, 1  ;;  %p36_p7 = scmp.eq.s32.totalorder %s33_s17, 0 }
   0xd   : > { %p628_p8 = por %p52_p5, %p51_p3  ;;  %p83_p10 = scmp.eq.s32.totalorder %s353_s13, 1 }
   0xe   : > { %p632_p9 = por %p77_p6, %p45_p1  ;;  %p393_p13 = scmp.lt.s32.totalorder %s565_s11, 2 }
   0xf   : > { %s637_s20 = scalar_select %p36_p7, %s553_s8, %s38_s15  }
  0x10   : > { %s760_s19 = scalar_select %p632_p9, 1, 0 }
  0x11   : > { %p639_p11 = por %p83_p10, %p51_p3  ;;  %s103_s22 = sand.u32 1, %s553_s8  }
  0x12   : > { %s356_s23 = sshll.u32 %s103_s22, 4  ;;  %s374_s24 = sshll.u32 %s561_s10, 8 }
  0x13   : > { %s761_s21 = scalar_select %p639_p11, 1, 0 }
  0x14   : > { %s650_s27 = scalar_lea.hbm %s755_s0, %s374_s24  ;;  %s107_s28 = scalar_lea.vmem [#allocation2], %s356_s23 }
  0x15   : > { %s115_s29 = sshll.u32 %s107_s28, 4  ;;  %p656_p0 = pnand %p393_p13, %p622_p4  ;;  %s652_s29 = int_to_ptr.vmem [resolvable:$true] %s115_s29 }
  0x16   : > { %s661_s2 = scalar_lea.sflag [#allocation3], %s103_s22  ;;  %s453_s3 = scalar_lea.hbm %s650_s27, 256 }
  0x17   : > { %p454_p2 = scmp.ne.s32.totalorder %s650_s27, %s453_s3  ;;  %p455_p3 = pneg %p656_p0 }
  0x18   : > { %s458_s12 = scalar_lea.hbm %s755_s0, 512  ;;  %p459_p4 = scmp.lt.u32.totalorder %s650_s27, %s755_s0 }
  0x19   : > { %p456_p5 = pnand %p455_p3, %p454_p2  ;;  %p460_p7 = scmp.lt.u32.totalorder %s458_s12, %s453_s3 }
  0x1a   : > { %p462_p13 = scmp.lt.u32.totalorder %s453_s3, %s650_s27 }
  0x1b   : > { %p457_p6 = pneg %p456_p5  ;;  %p461_p10 = por %p460_p7, %p459_p4 }
  0x1d   : > { %p463_p12 = por %p462_p13, %p461_p10 }
  0x1f   : > { %p464_p1 = pnand %p463_p12, %p457_p6 }
  0x21   : > { %467 = shalt.err (!%p464_p1)
}
  0x22   : > { %s468_s16 = scalar_lea.vmem %s652_s29, 256  ;;  %s567_s17 = smov [#allocation2]  }
  0x23   : > { %p469_p2 = scmp.ne.s32.totalorder %s652_s29, %s468_s16  ;;  %s473_s22 = sshll.u32 %s567_s17, 4  ;;  %s474_s22 = int_to_ptr.vmem [resolvable:$false] %s473_s22 }
  0x24   : > { %s475_s23 = scalar_lea.vmem %s474_s22, 512  ;;  %p476_p9 = scmp.lt.s32.totalorder %s652_s29, %s474_s22 }
  0x25   : > { %p471_p5 = pnand %p469_p2, %p455_p3  ;;  %p477_p4 = scmp.lt.s32.totalorder %s475_s23, %s468_s16 }
  0x27   : > { %p472_p11 = pneg %p471_p5  ;;  %p478_p7 = por %p477_p4, %p476_p9 }
  0x29   : > { %p479_p10 = pnand %p478_p7, %p472_p11 }
  0x2b   : > { %482 = shalt.err (!%p479_p10)
}
  0x2c   : > { %s568_s24 = smov 32   ;;  %s569_s25 = smov 2  }
  0x2d   : > { %388 = dma.hbm_to_vmem [thread:$0]  (!%p656_p0), %s650_s27, 256, %s652_s29, %s661_s2, %s568_s24, %s568_s24, %s569_s25  }
  0x2e   : > { %p123_p12 = scmp.lt.s32.totalorder %s565_s11, 3  ;;  %p763_p1 = scmp.ge.s32.totalorder %s565_s11, 1 }
  0x30   : > { %p124_p3 = pnand %p763_p1, %p123_p12 }
  0x31   : > { %s693_s26 = sand.u32 (!%p124_p3), 1, %s549_s7  }
  0x32   : > { %127 = sbr.rel (%p124_p3) target bundleno = 126 (0x7e), region = 24  ;;  %s360_s28 = sshll.u32 (!%p124_p3), %s693_s26, 4 }
  0x33   : > { %s130_s3 = scalar_lea.sflag (!%p124_p3), [#allocation3], %s693_s26  ;;  %s133_s4 = scalar_lea.vmem (!%p124_p3), [#allocation2], %s360_s28 }
  0x39   : > { %536 = dma.done.wait (%p628_p8), %s130_s3, 256  }
  0x3a   : > { %538 = vsyncadd (%p628_p8), %s130_s3, 4294967040  ;;  %v152_v0 = vld [vmem:[%s133_s4] sm:$0x3]  ;;  %v362_v1 = vld [vmem:[%s133_s4 + $0x2] sm:$0x3]  ;;  %s361_s18 = sshll.u32 %s693_s26, 1 }
  0x3b   : > { %v363_v2 = vld [vmem:[%s133_s4 + $0x4] sm:$0x3]  ;;  %v364_v3 = vld [vmem:[%s133_s4 + $0x6] sm:$0x3]  ;;  %v167_v4 = vmul.f32 0.09158681, %v152_v0 }
  0x3c   : > { %v168_v5 = vmul.f32 -0.35462755, %v362_v1  ;;  %v170_v6 = vmul.f32 -0.57958287, %v363_v2  ;;  %v365_v7 = vld [vmem:[%s133_s4 + $0x8] sm:$0x3] }
  0x3d   : > { %v366_v8 = vld [vmem:[%s133_s4 + $0xa] sm:$0x3]  ;;  %v172_v10 = vmul.f32 -0.1890537, %v364_v3  ;;  %v188_v11 = vmul.f32 -0.42661652, %v152_v0 }
  0x3e   : > { %v169_v9 = vadd.f32 %v168_v5, %v167_v4  ;;  %v189_v12 = vmul.f32 0.6534557, %v362_v1  ;;  %v191_v13 = vmul.f32 -0.0054964093, %v363_v2  ;;  %v367_v14 = vld [vmem:[%s133_s4 + $0xc] sm:$0x3] }
  0x3f   : > { %v174_v16 = vmul.f32 -0.46305493, %v365_v7  ;;  %v193_v18 = vmul.f32 0.25816816, %v364_v3  ;;  %v176_v19 = vmul.f32 0.13194306, %v366_v8 }
  0x40   : > { %v171_v15 = vadd.f32 %v170_v6, %v169_v9  ;;  %v190_v17 = vadd.f32 %v189_v12, %v188_v11  ;;  %v210_v20 = vmul.f32 -0.070534006, %v152_v0  ;;  %v211_v21 = vmul.f32 -0.29084826, %v362_v1  ;;  %v368_v26 = vld [vmem:[%s133_s4 + $0xe] sm:$0x3] }
  0x41   : > { %v195_v24 = vmul.f32 -0.17079121, %v365_v7  ;;  %v213_v25 = vmul.f32 0.33572263, %v363_v2  ;;  %v178_v27 = vmul.f32 0.45795196, %v367_v14 }
  0x42   : > { %v173_v22 = vadd.f32 %v172_v10, %v171_v15  ;;  %v192_v23 = vadd.f32 %v191_v13, %v190_v17  ;;  %v212_v28 = vadd.f32 %v211_v21, %v210_v20  ;;  %v215_v29 = vmul.f32 0.18488437, %v364_v3  ;;  %s151_s27 = scalar_lea.vmem [#allocation5], %s361_s18  ;;  %s371_s30 = sshll.u32 %s557_s9, 5 }
  0x43   : > { %v197_v32 = vmul.f32 -0.29246065, %v366_v8  ;;  %v232_v33 = vmul.f32 -0.6185725, %v152_v0  ;;  %v217_v35 = vmul.f32 -0.3276999, %v365_v7  ;;  %s708_s12 = scalar_lea.hbm %s756_s1, %s371_s30 }
  0x44   : > { %v175_v30 = vadd.f32 %v174_v16, %v173_v22  ;;  %v194_v31 = vadd.f32 %v193_v18, %v192_v23  ;;  %v214_v34 = vadd.f32 %v213_v25, %v212_v28  ;;  %v233_v36 = vmul.f32 0.021811143, %v362_v1  ;;  %s271_s29 = sshll.u32 %s151_s27, 4  ;;  %s257_s13 = scalar_lea.sflag [#allocation4], %s693_s26  ;;  %s703_s29 = int_to_ptr.vmem [resolvable:$true] %s271_s29 }
  0x45   : > { %v235_v37 = vmul.f32 0.6606441, %v363_v2  ;;  %v180_v39 = vmul.f32 0.22944455, %v368_v26  ;;  %v199_v41 = vmul.f32 0.15876421, %v367_v14 }
  0x46   : > { %v177_v38 = vadd.f32 %v176_v19, %v175_v30  ;;  %v196_v40 = vadd.f32 %v195_v24, %v194_v31  ;;  %v216_v42 = vadd.f32 %v215_v29, %v214_v34  ;;  %v219_v43 = vmul.f32 0.30899802, %v366_v8  ;;  %s483_s15 = scalar_lea.vmem %s703_s29, 32  ;;  %p764_p9 = scmp.ne.s32.totalorder %s760_s19, 0 }
  0x47   : > { %v234_v44 = vadd.f32 %v233_v36, %v232_v33  ;;  %v237_v45 = vmul.f32 -0.37341136, %v364_v3  ;;  %v201_v48 = vmul.f32 0.42942297, %v368_v26  ;;  %v221_v50 = vmul.f32 0.19037618, %v367_v14  ;;  %p484_p8 = scmp.ne.s32.totalorder %s703_s29, %s483_s15 }
  0x48   : > { %v179_v46 = vadd.f32 %v178_v27, %v177_v38  ;;  %v198_v47 = vadd.f32 %v197_v32, %v196_v40  ;;  %v218_v49 = vadd.f32 %v217_v35, %v216_v42  ;;  %v239_v52 = vmul.f32 -0.06520778, %v365_v7  ;;  %s570_s9 = smov [#allocation5]  }
  0x49   : > { %v236_v51 = vadd.f32 %v235_v37, %v234_v44  ;;  %v223_v56 = vmul.f32 -0.7241756, %v368_v26  ;;  %v241_v58 = vmul.f32 -0.08014249, %v366_v8  ;;  %v243_v63 = vmul.f32 0.17404635, %v367_v14  ;;  %p485_p11 = pnand %p484_p8, %p764_p9 }
  0x4a   : > { %v181_v53 = vadd.f32 %v180_v39, %v179_v46  ;;  %v200_v54 = vadd.f32 %v199_v41, %v198_v47  ;;  %v220_v55 = vadd.f32 %v219_v43, %v218_v49  ;;  %v245_v3 = vmul.f32 -0.0062186574, %v368_v26  ;;  %s487_s16 = sshll.u32 %s570_s9, 4  ;;  %s488_s16 = int_to_ptr.vmem [resolvable:$false] %s487_s16 }
  0x4b   : > { %v238_v57 = vadd.f32 %v237_v45, %v236_v51  ;;  %p486_p0 = pneg %p485_p11  ;;  %s489_s17 = scalar_lea.vmem %s488_s16, 64 }
  0x4c   : > { %v182_v59 = vadd.f32 -0.14562732, %v181_v53  ;;  %v202_v60 = vadd.f32 %v201_v48, %v200_v54  ;;  %v222_v61 = vadd.f32 %v221_v50, %v220_v55  ;;  %p490_p6 = scmp.lt.s32.totalorder %s703_s29, %s488_s16  ;;  %p491_p13 = scmp.lt.s32.totalorder %s489_s17, %s483_s15 }
  0x4d   : > { %v240_v62 = vadd.f32 %v239_v52, %v238_v57 }
  0x4e   : > { %445 = vtanh.f32 %v182_v59  ;;  %v203_v0 = vadd.f32 -0.09743365, %v202_v60  ;;  %v224_v1 = vadd.f32 %v223_v56, %v222_v61  ;;  %p492_p2 = por %p491_p13, %p490_p6 }
  0x4f   : > { %v242_v2 = vadd.f32 %v241_v58, %v240_v62 }
  0x50   : > { %447 = vtanh.f32 %v203_v0  ;;  %v225_v4 = vadd.f32 0.085989095, %v224_v1  ;;  %p493_p5 = pnand %p492_p2, %p486_p0 }
  0x51   : > { %v244_v5 = vadd.f32 %v243_v63, %v242_v2 }
  0x52   : > { %449 = vtanh.f32 %v225_v4 }
  0x53   : > { %v246_v6 = vadd.f32 %v245_v3, %v244_v5 }
  0x55   : > { %v247_v7 = vadd.f32 -0.241529, %v246_v6 }
  0x57   : > { %451 = vtanh.f32 %v247_v7 }
  0x58   : > { %v446_v9 = vpop.eup %445 }
  0x59   : > { %v184_v10 = vmul.f32 3.5035, %v446_v9 }
  0x5a   : > { %v448_v8 = vpop.eup %447 }
  0x5b   : > { %v369_v11 = vadd.f32 -0.5, %v184_v10  ;;  %v205_v12 = vmul.f32 2.002, %v448_v8 }
  0x5c   : > { %v450_v13 = vpop.eup %449 }
  0x5d   : > { %v375_v14 = vround.rtne.f32 %v369_v11  ;;  %v376_v15 = vround.rtne.f32 %v205_v12  ;;  %v227_v16 = vmul.f32 2.002, %v450_v13 }
  0x5f   : > { %v187_v17 = vadd.f32 4.0, %v375_v14  ;;  %v207_v18 = vadd.f32 2.0, %v376_v15  ;;  %v377_v19 = vround.rtne.f32 %v227_v16 }
  0x61   : > { %v452_v20 = vpop.eup %451  ;;  %v208_v21 = vmul.f32 8.0, %v207_v18  ;;  %v229_v22 = vadd.f32 2.0, %v377_v19 }
  0x62   : > { %v249_v23 = vmul.f32 2.002, %v452_v20 }
  0x63   : > { %v209_v24 = vadd.f32 %v208_v21, %v187_v17  ;;  %v230_v25 = vmul.f32 40.0, %v229_v22 }
  0x64   : > { %v378_v26 = vround.rtne.f32 %v249_v23 }
  0x65   : > { %v231_v27 = vadd.f32 %v230_v25, %v209_v24 }
  0x66   : > { %v251_v28 = vadd.f32 2.0, %v378_v26 }
  0x68   : > { %v252_v29 = vmul.f32 200.0, %v251_v28 }
  0x6a   : > { %v253_v30 = vadd.f32 %v252_v29, %v231_v27 }
  0x6c   : > { %v379_v31 = vtrunc.f32 %v253_v30 }
  0x6e   : > { %v380_v32 = vcvt.f32.s32 %v379_v31 }
  0x70   : > { %255 = vst [vmem:[%s151_s27] sm:$0x3] %v380_v32 }
  0x71   : > { %496 = shalt.err (!%p493_p5)
}
  0x72   : > { %s497_s22 = scalar_lea.hbm %s708_s12, 32  ;;  %s501_s25 = scalar_lea.hbm %s756_s1, 64 }
  0x73   : > { %p498_p4 = scmp.ne.s32.totalorder %s708_s12, %s497_s22  ;;  %p502_p12 = scmp.lt.u32.totalorder %s708_s12, %s756_s1 }
  0x74   : > { %p503_p1 = scmp.lt.u32.totalorder %s501_s25, %s497_s22  ;;  %p505_p8 = scmp.lt.u32.totalorder %s497_s22, %s708_s12 }
  0x75   : > { %p499_p7 = pnand %p498_p4, %p764_p9 }
  0x76   : > { %p504_p3 = por %p503_p1, %p502_p12 }
  0x77   : > { %p500_p10 = pneg %p499_p7 }
  0x78   : > { %p506_p11 = por %p505_p8, %p504_p3 }
  0x7a   : > { %p507_p0 = pnand %p506_p11, %p500_p10 }
  0x7c   : > { %510 = shalt.err (!%p507_p0)
}
  0x7d   : > { %383 = dma.vmem_to_hbm [thread:$0]  (%p764_p9), %s703_s29, 32, %s708_s12, %s257_s13  }
  0x7e PF: > { %s283_s3 = sand.u32 1, %s545_s6   ;;  %p765_p6 = scmp.ne.s32.totalorder %s761_s21, 0 }
  0x7f   : > { %p766_p13 = scmp.ge.s32.totalorder %s565_s11, 2  ;;  %s284_s4 = scalar_lea.sflag [#allocation4], %s283_s3 }
  0x81   : > { %p390_p2 = pnand %p766_p13, %p765_p6 }
  0x83   : > { %540 = dma.done.wait (!%p390_p2), %s284_s4, 32  }
  0x84   : > { %542 = vsyncadd (!%p390_p2), %s284_s4, 4294967264  ;;  %s17_s11 = sadd.s32 1, %s565_s11   ;;  %s767_s6 = smov %s549_s7 }
  0x85   : > { %p14_p5 = scmp.ge.s32.totalorder %s17_s11, 4   ;;  %s768_s7 = smov %s553_s8 }
  0x86   : > { %s769_s8 = smov %s637_s20  ;;  %s770_s9 = smov %s561_s10 }
  0x87   : > { %s771_s10 = smov %s773_s14  ;;  %16 = sbr.rel (!%p14_p5) target bundleno = 6 (0x6), region = 76 }
  0x8e   :  { %289 = vsyncpa [#allocation3], 1 }
  0x8f   :  { %291 = vsyncpa [#allocation3 + $0x1], 1 }
  0x90   :  { %292 = vsyncpa [#allocation4], 1 }
  0x91   :  { %294 = vsyncpa [#allocation4 + $0x1], 1 }

</bundles_post_ra>
